<compile_context>
chip_gen: v7x
topology: tpu7x:2x2x1
jax: 0.10.0
libtpu: 0.0.40
codegen_flags: <defaults>
</compile_context>

<pallas_src>
import functools
import math

import jax
import jax.numpy as jnp
from jax.experimental import pallas as pl
from jax.experimental.pallas import tpu as pltpu


def _lstm_kernel(x_ref, wih_ref, whh_ref, b_ref, wfc_ref, bfc_ref,
                 out_ref, gx_ref, *, n_steps, b_pad, hidden, hoist_whh,
                 unroll):
    """Single-invocation LSTM recurrence + fc + relu.

    Refs:
      x_ref  : (n_steps * b_pad, D)   bf16 time-major inputs, batch padded
      wih_ref: (D, 4H)                bf16 input->gates weight (transposed;
                                      PyTorch gate order i, f, g, o)
      whh_ref: (H, 4H)                bf16 hidden->gates weight (transposed)
      b_ref  : (1, 4H)                f32 combined bias (b_ih + b_hh)
      wfc_ref: (H, O_pad)             bf16 fc weight (transposed, lane-padded)
      bfc_ref: (1, O_pad)             f32 fc bias (lane-padded)
      out_ref: (b_pad, O_pad)         f32 relu(fc(h_last))
      gx_ref : (n_steps * b_pad, 4H)  f32 VMEM scratch: x @ W_ih + bias
    """
    H = hidden

    # Hoisted input projection: one MXU matmul covering every timestep
    # (bf16 operands, f32 accumulation), plus the combined bias.
    gx_ref[...] = (
        jnp.dot(x_ref[...], wih_ref[...], preferred_element_type=jnp.float32)
        + b_ref[...])

    # Loop-invariant per-lane constants for the single-tanh gate trick:
    #   sigmoid(x) = 0.5 * tanh(0.5 * x) + 0.5
    # lanes [0,2H) and [3H,4H) are sigmoid gates (i, f, o); [2H,3H) is the
    # tanh gate (g).  Hoisted so the loop body carries plain vreg values
    # (JAX does not CSE broadcast_in_dim inside loop bodies).
    lane = jax.lax.broadcasted_iota(jnp.int32, (b_pad, 4 * H), 1)
    is_g = (lane >= 2 * H) & (lane < 3 * H)
    scale = jnp.where(is_g, 1.0, 0.5).astype(jnp.float32)    # pre & post scale
    offset = jnp.where(is_g, 0.0, 0.5).astype(jnp.float32)   # post offset

    # Hoist W_hh into registers only when it is small; otherwise stream it
    # from VMEM each step (vld slots have slack; vregs do not).
    whh_hoisted = whh_ref[...] if hoist_whh else None

    def step(t, carry):
        h, c = carry
        row = pl.multiple_of(t * b_pad, 8)                    # sublane-aligned
        w = whh_hoisted if hoist_whh else whh_ref[...]
        gates = gx_ref[pl.ds(row, b_pad), :] + jnp.dot(
            h.astype(jnp.bfloat16), w,
            preferred_element_type=jnp.float32)               # (b_pad, 4H)
        # ONE full-vreg EUP pass (tanh) for all four gates.
        act = jnp.tanh(gates * scale) * scale + offset
        i_g = act[:, 0 * H:1 * H]
        f_g = act[:, 1 * H:2 * H]
        g_g = act[:, 2 * H:3 * H]
        o_g = act[:, 3 * H:4 * H]
        c_new = f_g * c + i_g * g_g
        h_new = o_g * jnp.tanh(c_new)
        return (h_new, c_new)

    h0 = jnp.zeros((b_pad, H), jnp.float32)
    c0 = jnp.zeros((b_pad, H), jnp.float32)
    h_last, _ = jax.lax.fori_loop(0, n_steps, step, (h0, c0), unroll=unroll)

    y = jnp.dot(h_last.astype(jnp.bfloat16), wfc_ref[...],
                preferred_element_type=jnp.float32) + bfc_ref[...]
    out_ref[...] = jnp.maximum(y, 0.0)            # full-tile, unmasked store


def _round_up(x, m):
    return (x + m - 1) // m * m


def _nbytes(shape, dtype):
    return math.prod(shape) * jnp.dtype(dtype).itemsize


@jax.jit
def lstm_forward(x, params):
    """x: (B, input_size, T) float32. Returns (B, output_size) float32."""
    wih, whh, b_ih, b_hh, wfc, bfc = params
    B, D, T = x.shape
    H = whh.shape[1]          # whh: (4H, H)
    O = wfc.shape[0]          # wfc: (O, H)
    if T < 2:
        raise ValueError("LSTM forward requires T >= 2: the reference loop "
                         "runs over range(T - 1) and leaves `out` undefined "
                         "for T == 1.")
    n_steps = T - 1           # reference intentionally skips the last timestep

    b_pad = _round_up(max(B, 8), 8)       # fill sublanes
    o_pad = _round_up(max(O, 128), 128)   # lane-dense output

    # Time-major, drop last timestep, zero-pad batch, flatten (t, b) -> rows.
    xt = jnp.transpose(x, (2, 0, 1))[:n_steps]                   # (n_steps, B, D)
    xt = jnp.pad(xt, ((0, 0), (0, b_pad - B), (0, 0)))
    x2d = xt.reshape(n_steps * b_pad, D).astype(jnp.bfloat16)

    # MXU operands in bf16; biases (added to f32 accumulators) stay f32.
    wih_t = wih.T.astype(jnp.bfloat16)                           # (D, 4H)
    whh_t = whh.T.astype(jnp.bfloat16)                           # (H, 4H)
    b = (b_ih + b_hh).astype(jnp.float32)[None, :]               # (1, 4H)
    wfc_t = jnp.pad(wfc.T, ((0, 0), (0, o_pad - O))).astype(jnp.bfloat16)
    bfc_p = jnp.pad(bfc.astype(jnp.float32), (0, o_pad - O))[None, :]

    # Static kernel knobs.
    hoist_whh = H <= 64
    if n_steps <= 16:
        unroll = True
    elif H <= 64:
        unroll = 8
    else:
        unroll = 2

    # Size the scoped-VMEM limit from the actual resident footprint
    # (double-buffered inputs/outputs + scratch) with headroom; clamp to a
    # range that is safe on v5e (16 MiB default) through v7x (64 MiB phys).
    resident = (2 * (_nbytes((n_steps * b_pad, D), jnp.bfloat16)
                     + _nbytes((D, 4 * H), jnp.bfloat16)
                     + _nbytes((H, 4 * H), jnp.bfloat16)
                     + _nbytes((1, 4 * H), jnp.float32)
                     + _nbytes((H, o_pad), jnp.bfloat16)
                     + _nbytes((1, o_pad), jnp.float32)
                     + _nbytes((b_pad, o_pad), jnp.float32))
                + _nbytes((n_steps * b_pad, 4 * H), jnp.float32))
    vmem_limit = int(min(max(2 * resident + (8 << 20), 32 << 20), 64 << 20))

    kernel = functools.partial(_lstm_kernel, n_steps=n_steps, b_pad=b_pad,
                               hidden=H, hoist_whh=hoist_whh, unroll=unroll)

    out = pl.pallas_call(
        kernel,
        out_shape=jax.ShapeDtypeStruct((b_pad, o_pad), jnp.float32),
        grid_spec=pltpu.PrefetchScalarGridSpec(
            num_scalar_prefetch=0,
            grid=(1,),                      # single invocation; loop in-kernel
            in_specs=[
                pl.BlockSpec((n_steps * b_pad, D), lambda i: (0, 0)),
                pl.BlockSpec((D, 4 * H), lambda i: (0, 0)),
                pl.BlockSpec((H, 4 * H), lambda i: (0, 0)),
                pl.BlockSpec((1, 4 * H), lambda i: (0, 0)),
                pl.BlockSpec((H, o_pad), lambda i: (0, 0)),
                pl.BlockSpec((1, o_pad), lambda i: (0, 0)),
            ],
            out_specs=pl.BlockSpec((b_pad, o_pad), lambda i: (0, 0)),
            scratch_shapes=[pltpu.VMEM((n_steps * b_pad, 4 * H), jnp.float32)],
        ),
        compiler_params=pltpu.CompilerParams(
            dimension_semantics=("arbitrary",),
            vmem_limit_bytes=vmem_limit),
    )(x2d, wih_t, whh_t, b, wfc_t, bfc_p)

    return out[:B, :O]


@jax.jit
def lstm_reference(x, params):
    """Pure-JAX f32 reference matching PyTorch nn.LSTM + Linear + relu."""
    wih, whh, b_ih, b_hh, wfc, bfc = params
    B, D, T = x.shape
    H = whh.shape[1]
    xt = jnp.transpose(x, (0, 2, 1))          # (B, T, D)

    def step(carry, x_t):
        h, c = carry
        gates = x_t @ wih.T + b_ih + h @ whh.T + b_hh
        i_g = jax.nn.sigmoid(gates[:, 0 * H:1 * H])
        f_g = jax.nn.sigmoid(gates[:, 1 * H:2 * H])
        g_g = jnp.tanh(gates[:, 2 * H:3 * H])
        o_g = jax.nn.sigmoid(gates[:, 3 * H:4 * H])
        c_new = f_g * c + i_g * g_g
        h_new = o_g * jnp.tanh(c_new)
        return (h_new, c_new), None

    h0 = jnp.zeros((B, H), jnp.float32)
    c0 = jnp.zeros((B, H), jnp.float32)
    (h, _), _ = jax.lax.scan(step, (h0, c0),
                             jnp.transpose(xt[:, :T - 1, :], (1, 0, 2)))
    return jnp.maximum(h @ wfc.T + bfc, 0.0)


def init_params(key, input_size, hidden_size, output_size):
    """Deterministic init mimicking PyTorch defaults (uniform +/- 1/sqrt(fan))."""
    k = jax.random.split(key, 6)
    s_lstm = 1.0 / jnp.sqrt(hidden_size)
    s_fc = 1.0 / jnp.sqrt(hidden_size)
    wih = jax.random.uniform(k[0], (4 * hidden_size, input_size),
                             jnp.float32, -s_lstm, s_lstm)
    whh = jax.random.uniform(k[1], (4 * hidden_size, hidden_size),
                             jnp.float32, -s_lstm, s_lstm)
    b_ih = jax.random.uniform(k[2], (4 * hidden_size,), jnp.float32, -s_lstm, s_lstm)
    b_hh = jax.random.uniform(k[3], (4 * hidden_size,), jnp.float32, -s_lstm, s_lstm)
    wfc = jax.random.uniform(k[4], (output_size, hidden_size),
                             jnp.float32, -s_fc, s_fc)
    bfc = jax.random.uniform(k[5], (output_size,), jnp.float32, -s_fc, s_fc)
    return (wih, whh, b_ih, b_hh, wfc, bfc)


if __name__ == "__main__":
    B, INPUT, T, HIDDEN, OUTPUT = 2, 4, 8, 32, 4

    key = jax.random.PRNGKey(0)
    k_x, k_p = jax.random.split(key)
    x = jax.random.normal(k_x, (B, INPUT, T), jnp.float32)   # (B, input_size, seq)
    params = init_params(k_p, INPUT, HIDDEN, OUTPUT)

    out = jax.block_until_ready(lstm_forward(x, params))
    ref = jax.block_until_ready(lstm_reference(x, params))

    assert out.shape == (B, OUTPUT), out.shape
    # bf16 MXU operands (f32 accumulation / gate math) -> relaxed tolerance.
    assert jnp.allclose(out, ref, atol=2e-2, rtol=2e-2), (out, ref)
    print("KERNEL_OK")
</pallas_src>

<mosaic_0001>
module attributes {stable_mosaic.version = 11 : i64} {
  func.func @_lstm_kernel(%arg0: i32, %arg1: memref<56x4xbf16, #tpu.memory_space<vmem>>, %arg2: memref<4x128xbf16, #tpu.memory_space<vmem>>, %arg3: memref<32x128xbf16, #tpu.memory_space<vmem>>, %arg4: memref<1x128xf32, #tpu.memory_space<vmem>>, %arg5: memref<32x128xbf16, #tpu.memory_space<vmem>>, %arg6: memref<1x128xf32, #tpu.memory_space<vmem>>, %arg7: memref<8x128xf32, #tpu.memory_space<vmem>>, %arg8: memref<56x128xf32, #tpu.memory_space<vmem>>) attributes {dimension_semantics = [#tpu.dimension_semantics<arbitrary>], iteration_bounds = array<i64: 1>, scalar_prefetch = 0 : i64, scratch_operands = 1 : i64, tpu.core_type = #tpu.core_type<tc>, window_params = [{pipeline_mode = #tpu.pipeline_mode<synchronous>, transform_indices = @transform_0, window_bounds = array<i64: 56, 4>}, {pipeline_mode = #tpu.pipeline_mode<synchronous>, transform_indices = @transform_1, window_bounds = array<i64: 4, 128>}, {pipeline_mode = #tpu.pipeline_mode<synchronous>, transform_indices = @transform_2, window_bounds = array<i64: 32, 128>}, {pipeline_mode = #tpu.pipeline_mode<synchronous>, transform_indices = @transform_3, window_bounds = array<i64: 1, 128>}, {pipeline_mode = #tpu.pipeline_mode<synchronous>, transform_indices = @transform_4, window_bounds = array<i64: 32, 128>}, {pipeline_mode = #tpu.pipeline_mode<synchronous>, transform_indices = @transform_5, window_bounds = array<i64: 1, 128>}, {pipeline_mode = #tpu.pipeline_mode<synchronous>, transform_indices = @transform_6, window_bounds = array<i64: 8, 128>}]} {
    %c0 = arith.constant 0 : index
    %c0_0 = arith.constant 0 : index
    %0 = vector.load %arg1[%c0, %c0_0] : memref<56x4xbf16, #tpu.memory_space<vmem>>, vector<56x4xbf16>
    %c0_1 = arith.constant 0 : index
    %c0_2 = arith.constant 0 : index
    %1 = vector.load %arg2[%c0_1, %c0_2] : memref<4x128xbf16, #tpu.memory_space<vmem>>, vector<4x128xbf16>
    %cst = arith.constant dense<0.000000e+00> : vector<56x128xf32>
    %2 = tpu.matmul %0, %1, %cst {dimension_numbers = #tpu.dot_dimension_numbers<[1], [0], [0], [1], [0, 0, 1, 1], [], []>} : vector<56x4xbf16>, vector<4x128xbf16>, vector<56x128xf32> -> vector<56x128xf32>
    %c0_3 = arith.constant 0 : index
    %c0_4 = arith.constant 0 : index
    %3 = vector.load %arg4[%c0_3, %c0_4] : memref<1x128xf32, #tpu.memory_space<vmem>>, vector<1x128xf32>
    %4 = vector.broadcast %3 : vector<1x128xf32> to vector<56x128xf32>
    %5 = arith.addf %2, %4 : vector<56x128xf32>
    %c0_5 = arith.constant 0 : index
    %c0_6 = arith.constant 0 : index
    %6 = vector.load %arg8[%c0_5, %c0_6] : memref<56x128xf32, #tpu.memory_space<vmem>>, vector<56x128xf32>
    tpu.vector_store %arg8[%c0_5, %c0_6], %5 {strides = array<i32>} : memref<56x128xf32, #tpu.memory_space<vmem>>, vector<56x128xf32>,
    %7 = tpu.iota {dimensions = array<i32: 1>} : vector<8x128xi32>
    %c64_i32 = arith.constant 64 : i32
    %8 = vector.broadcast %c64_i32 : i32 to vector<8x128xi32>
    %9 = arith.cmpi sge, %7, %8 : vector<8x128xi32>
    %c96_i32 = arith.constant 96 : i32
    %10 = vector.broadcast %c96_i32 : i32 to vector<8x128xi32>
    %11 = arith.cmpi slt, %7, %10 : vector<8x128xi32>
    %12 = arith.andi %9, %11 : vector<8x128xi1>
    %cst_7 = arith.constant 1.000000e+00 : f32
    %cst_8 = arith.constant 5.000000e-01 : f32
    %13 = vector.broadcast %cst_7 : f32 to vector<8x128xf32>
    %14 = vector.broadcast %cst_8 : f32 to vector<8x128xf32>
    %15 = arith.select %12, %13, %14 : vector<8x128xi1>, vector<8x128xf32>
    %cst_9 = arith.constant 0.000000e+00 : f32
    %cst_10 = arith.constant 5.000000e-01 : f32
    %16 = vector.broadcast %cst_9 : f32 to vector<8x128xf32>
    %17 = vector.broadcast %cst_10 : f32 to vector<8x128xf32>
    %18 = arith.select %12, %16, %17 : vector<8x128xi1>, vector<8x128xf32>
    %c0_11 = arith.constant 0 : index
    %c0_12 = arith.constant 0 : index
    %19 = vector.load %arg3[%c0_11, %c0_12] : memref<32x128xbf16, #tpu.memory_space<vmem>>, vector<32x128xbf16>
    %cst_13 = arith.constant 0.000000e+00 : f32
    %20 = vector.broadcast %cst_13 : f32 to vector<8x32xf32>
    %cst_14 = arith.constant 0.000000e+00 : f32
    %21 = vector.broadcast %cst_14 : f32 to vector<8x32xf32>
    %c0_i32 = arith.constant 0 : i32
    %c8_i32 = arith.constant 8 : i32
    %22 = arith.muli %c0_i32, %c8_i32 : i32
    %23 = tpu.assume_multiple %22, 8 : i32
    %24 = arith.index_cast %23 : i32 to index
    %c0_15 = arith.constant 0 : index
    %25 = vector.load %arg8[%24, %c0_15] : memref<56x128xf32, #tpu.memory_space<vmem>>, vector<8x128xf32>
    %26 = arith.truncf %20 : vector<8x32xf32> to vector<8x32xbf16>
    %cst_16 = arith.constant dense<0.000000e+00> : vector<8x128xf32>
    %27 = tpu.matmul %26, %19, %cst_16 {dimension_numbers = #tpu.dot_dimension_numbers<[1], [0], [0], [1], [0, 0, 1, 1], [], []>} : vector<8x32xbf16>, vector<32x128xbf16>, vector<8x128xf32> -> vector<8x128xf32>
    %28 = arith.addf %25, %27 : vector<8x128xf32>
    %29 = arith.mulf %28, %15 : vector<8x128xf32>
    %30 = math.tanh %29 : vector<8x128xf32>
    %31 = arith.mulf %30, %15 : vector<8x128xf32>
    %32 = arith.addf %31, %18 : vector<8x128xf32>
    %33 = vector.extract_strided_slice %32 {offsets = [0, 0], sizes = [8, 32], strides = [1, 1]} : vector<8x128xf32> to vector<8x32xf32>
    %34 = vector.extract_strided_slice %32 {offsets = [0, 32], sizes = [8, 32], strides = [1, 1]} : vector<8x128xf32> to vector<8x32xf32>
    %35 = vector.extract_strided_slice %32 {offsets = [0, 64], sizes = [8, 32], strides = [1, 1]} : vector<8x128xf32> to vector<8x32xf32>
    %36 = vector.extract_strided_slice %32 {offsets = [0, 96], sizes = [8, 32], strides = [1, 1]} : vector<8x128xf32> to vector<8x32xf32>
    %37 = arith.mulf %34, %21 : vector<8x32xf32>
    %38 = arith.mulf %33, %35 : vector<8x32xf32>
    %39 = arith.addf %37, %38 : vector<8x32xf32>
    %40 = math.tanh %39 : vector<8x32xf32>
    %41 = arith.mulf %36, %40 : vector<8x32xf32>
    %c1_i32 = arith.constant 1 : i32
    %c8_i32_17 = arith.constant 8 : i32
    %42 = arith.muli %c1_i32, %c8_i32_17 : i32
    %43 = tpu.assume_multiple %42, 8 : i32
    %44 = arith.index_cast %43 : i32 to index
    %c0_18 = arith.constant 0 : index
    %45 = vector.load %arg8[%44, %c0_18] : memref<56x128xf32, #tpu.memory_space<vmem>>, vector<8x128xf32>
    %46 = arith.truncf %41 : vector<8x32xf32> to vector<8x32xbf16>
    %cst_19 = arith.constant dense<0.000000e+00> : vector<8x128xf32>
    %47 = tpu.matmul %46, %19, %cst_19 {dimension_numbers = #tpu.dot_dimension_numbers<[1], [0], [0], [1], [0, 0, 1, 1], [], []>} : vector<8x32xbf16>, vector<32x128xbf16>, vector<8x128xf32> -> vector<8x128xf32>
    %48 = arith.addf %45, %47 : vector<8x128xf32>
    %49 = arith.mulf %48, %15 : vector<8x128xf32>
    %50 = math.tanh %49 : vector<8x128xf32>
    %51 = arith.mulf %50, %15 : vector<8x128xf32>
    %52 = arith.addf %51, %18 : vector<8x128xf32>
    %53 = vector.extract_strided_slice %52 {offsets = [0, 0], sizes = [8, 32], strides = [1, 1]} : vector<8x128xf32> to vector<8x32xf32>
    %54 = vector.extract_strided_slice %52 {offsets = [0, 32], sizes = [8, 32], strides = [1, 1]} : vector<8x128xf32> to vector<8x32xf32>
    %55 = vector.extract_strided_slice %52 {offsets = [0, 64], sizes = [8, 32], strides = [1, 1]} : vector<8x128xf32> to vector<8x32xf32>
    %56 = vector.extract_strided_slice %52 {offsets = [0, 96], sizes = [8, 32], strides = [1, 1]} : vector<8x128xf32> to vector<8x32xf32>
    %57 = arith.mulf %54, %39 : vector<8x32xf32>
    %58 = arith.mulf %53, %55 : vector<8x32xf32>
    %59 = arith.addf %57, %58 : vector<8x32xf32>
    %60 = math.tanh %59 : vector<8x32xf32>
    %61 = arith.mulf %56, %60 : vector<8x32xf32>
    %c2_i32 = arith.constant 2 : i32
    %c8_i32_20 = arith.constant 8 : i32
    %62 = arith.muli %c2_i32, %c8_i32_20 : i32
    %63 = tpu.assume_multiple %62, 8 : i32
    %64 = arith.index_cast %63 : i32 to index
    %c0_21 = arith.constant 0 : index
    %65 = vector.load %arg8[%64, %c0_21] : memref<56x128xf32, #tpu.memory_space<vmem>>, vector<8x128xf32>
    %66 = arith.truncf %61 : vector<8x32xf32> to vector<8x32xbf16>
    %cst_22 = arith.constant dense<0.000000e+00> : vector<8x128xf32>
    %67 = tpu.matmul %66, %19, %cst_22 {dimension_numbers = #tpu.dot_dimension_numbers<[1], [0], [0], [1], [0, 0, 1, 1], [], []>} : vector<8x32xbf16>, vector<32x128xbf16>, vector<8x128xf32> -> vector<8x128xf32>
    %68 = arith.addf %65, %67 : vector<8x128xf32>
    %69 = arith.mulf %68, %15 : vector<8x128xf32>
    %70 = math.tanh %69 : vector<8x128xf32>
    %71 = arith.mulf %70, %15 : vector<8x128xf32>
    %72 = arith.addf %71, %18 : vector<8x128xf32>
    %73 = vector.extract_strided_slice %72 {offsets = [0, 0], sizes = [8, 32], strides = [1, 1]} : vector<8x128xf32> to vector<8x32xf32>
    %74 = vector.extract_strided_slice %72 {offsets = [0, 32], sizes = [8, 32], strides = [1, 1]} : vector<8x128xf32> to vector<8x32xf32>
    %75 = vector.extract_strided_slice %72 {offsets = [0, 64], sizes = [8, 32], strides = [1, 1]} : vector<8x128xf32> to vector<8x32xf32>
    %76 = vector.extract_strided_slice %72 {offsets = [0, 96], sizes = [8, 32], strides = [1, 1]} : vector<8x128xf32> to vector<8x32xf32>
    %77 = arith.mulf %74, %59 : vector<8x32xf32>
    %78 = arith.mulf %73, %75 : vector<8x32xf32>
    %79 = arith.addf %77, %78 : vector<8x32xf32>
    %80 = math.tanh %79 : vector<8x32xf32>
    %81 = arith.mulf %76, %80 : vector<8x32xf32>
    %c3_i32 = arith.constant 3 : i32
    %c8_i32_23 = arith.constant 8 : i32
    %82 = arith.muli %c3_i32, %c8_i32_23 : i32
    %83 = tpu.assume_multiple %82, 8 : i32
    %84 = arith.index_cast %83 : i32 to index
    %c0_24 = arith.constant 0 : index
    %85 = vector.load %arg8[%84, %c0_24] : memref<56x128xf32, #tpu.memory_space<vmem>>, vector<8x128xf32>
    %86 = arith.truncf %81 : vector<8x32xf32> to vector<8x32xbf16>
    %cst_25 = arith.constant dense<0.000000e+00> : vector<8x128xf32>
    %87 = tpu.matmul %86, %19, %cst_25 {dimension_numbers = #tpu.dot_dimension_numbers<[1], [0], [0], [1], [0, 0, 1, 1], [], []>} : vector<8x32xbf16>, vector<32x128xbf16>, vector<8x128xf32> -> vector<8x128xf32>
    %88 = arith.addf %85, %87 : vector<8x128xf32>
    %89 = arith.mulf %88, %15 : vector<8x128xf32>
    %90 = math.tanh %89 : vector<8x128xf32>
    %91 = arith.mulf %90, %15 : vector<8x128xf32>
    %92 = arith.addf %91, %18 : vector<8x128xf32>
    %93 = vector.extract_strided_slice %92 {offsets = [0, 0], sizes = [8, 32], strides = [1, 1]} : vector<8x128xf32> to vector<8x32xf32>
    %94 = vector.extract_strided_slice %92 {offsets = [0, 32], sizes = [8, 32], strides = [1, 1]} : vector<8x128xf32> to vector<8x32xf32>
    %95 = vector.extract_strided_slice %92 {offsets = [0, 64], sizes = [8, 32], strides = [1, 1]} : vector<8x128xf32> to vector<8x32xf32>
    %96 = vector.extract_strided_slice %92 {offsets = [0, 96], sizes = [8, 32], strides = [1, 1]} : vector<8x128xf32> to vector<8x32xf32>
    %97 = arith.mulf %94, %79 : vector<8x32xf32>
    %98 = arith.mulf %93, %95 : vector<8x32xf32>
    %99 = arith.addf %97, %98 : vector<8x32xf32>
    %100 = math.tanh %99 : vector<8x32xf32>
    %101 = arith.mulf %96, %100 : vector<8x32xf32>
    %c4_i32 = arith.constant 4 : i32
    %c8_i32_26 = arith.constant 8 : i32
    %102 = arith.muli %c4_i32, %c8_i32_26 : i32
    %103 = tpu.assume_multiple %102, 8 : i32
    %104 = arith.index_cast %103 : i32 to index
    %c0_27 = arith.constant 0 : index
    %105 = vector.load %arg8[%104, %c0_27] : memref<56x128xf32, #tpu.memory_space<vmem>>, vector<8x128xf32>
    %106 = arith.truncf %101 : vector<8x32xf32> to vector<8x32xbf16>
    %cst_28 = arith.constant dense<0.000000e+00> : vector<8x128xf32>
    %107 = tpu.matmul %106, %19, %cst_28 {dimension_numbers = #tpu.dot_dimension_numbers<[1], [0], [0], [1], [0, 0, 1, 1], [], []>} : vector<8x32xbf16>, vector<32x128xbf16>, vector<8x128xf32> -> vector<8x128xf32>
    %108 = arith.addf %105, %107 : vector<8x128xf32>
    %109 = arith.mulf %108, %15 : vector<8x128xf32>
    %110 = math.tanh %109 : vector<8x128xf32>
    %111 = arith.mulf %110, %15 : vector<8x128xf32>
    %112 = arith.addf %111, %18 : vector<8x128xf32>
    %113 = vector.extract_strided_slice %112 {offsets = [0, 0], sizes = [8, 32], strides = [1, 1]} : vector<8x128xf32> to vector<8x32xf32>
    %114 = vector.extract_strided_slice %112 {offsets = [0, 32], sizes = [8, 32], strides = [1, 1]} : vector<8x128xf32> to vector<8x32xf32>
    %115 = vector.extract_strided_slice %112 {offsets = [0, 64], sizes = [8, 32], strides = [1, 1]} : vector<8x128xf32> to vector<8x32xf32>
    %116 = vector.extract_strided_slice %112 {offsets = [0, 96], sizes = [8, 32], strides = [1, 1]} : vector<8x128xf32> to vector<8x32xf32>
    %117 = arith.mulf %114, %99 : vector<8x32xf32>
    %118 = arith.mulf %113, %115 : vector<8x32xf32>
    %119 = arith.addf %117, %118 : vector<8x32xf32>
    %120 = math.tanh %119 : vector<8x32xf32>
    %121 = arith.mulf %116, %120 : vector<8x32xf32>
    %c5_i32 = arith.constant 5 : i32
    %c8_i32_29 = arith.constant 8 : i32
    %122 = arith.muli %c5_i32, %c8_i32_29 : i32
    %123 = tpu.assume_multiple %122, 8 : i32
    %124 = arith.index_cast %123 : i32 to index
    %c0_30 = arith.constant 0 : index
    %125 = vector.load %arg8[%124, %c0_30] : memref<56x128xf32, #tpu.memory_space<vmem>>, vector<8x128xf32>
    %126 = arith.truncf %121 : vector<8x32xf32> to vector<8x32xbf16>
    %cst_31 = arith.constant dense<0.000000e+00> : vector<8x128xf32>
    %127 = tpu.matmul %126, %19, %cst_31 {dimension_numbers = #tpu.dot_dimension_numbers<[1], [0], [0], [1], [0, 0, 1, 1], [], []>} : vector<8x32xbf16>, vector<32x128xbf16>, vector<8x128xf32> -> vector<8x128xf32>
    %128 = arith.addf %125, %127 : vector<8x128xf32>
    %129 = arith.mulf %128, %15 : vector<8x128xf32>
    %130 = math.tanh %129 : vector<8x128xf32>
    %131 = arith.mulf %130, %15 : vector<8x128xf32>
    %132 = arith.addf %131, %18 : vector<8x128xf32>
    %133 = vector.extract_strided_slice %132 {offsets = [0, 0], sizes = [8, 32], strides = [1, 1]} : vector<8x128xf32> to vector<8x32xf32>
    %134 = vector.extract_strided_slice %132 {offsets = [0, 32], sizes = [8, 32], strides = [1, 1]} : vector<8x128xf32> to vector<8x32xf32>
    %135 = vector.extract_strided_slice %132 {offsets = [0, 64], sizes = [8, 32], strides = [1, 1]} : vector<8x128xf32> to vector<8x32xf32>
    %136 = vector.extract_strided_slice %132 {offsets = [0, 96], sizes = [8, 32], strides = [1, 1]} : vector<8x128xf32> to vector<8x32xf32>
    %137 = arith.mulf %134, %119 : vector<8x32xf32>
    %138 = arith.mulf %133, %135 : vector<8x32xf32>
    %139 = arith.addf %137, %138 : vector<8x32xf32>
    %140 = math.tanh %139 : vector<8x32xf32>
    %141 = arith.mulf %136, %140 : vector<8x32xf32>
    %c6_i32 = arith.constant 6 : i32
    %c8_i32_32 = arith.constant 8 : i32
    %142 = arith.muli %c6_i32, %c8_i32_32 : i32
    %143 = tpu.assume_multiple %142, 8 : i32
    %144 = arith.index_cast %143 : i32 to index
    %c0_33 = arith.constant 0 : index
    %145 = vector.load %arg8[%144, %c0_33] : memref<56x128xf32, #tpu.memory_space<vmem>>, vector<8x128xf32>
    %146 = arith.truncf %141 : vector<8x32xf32> to vector<8x32xbf16>
    %cst_34 = arith.constant dense<0.000000e+00> : vector<8x128xf32>
    %147 = tpu.matmul %146, %19, %cst_34 {dimension_numbers = #tpu.dot_dimension_numbers<[1], [0], [0], [1], [0, 0, 1, 1], [], []>} : vector<8x32xbf16>, vector<32x128xbf16>, vector<8x128xf32> -> vector<8x128xf32>
    %148 = arith.addf %145, %147 : vector<8x128xf32>
    %149 = arith.mulf %148, %15 : vector<8x128xf32>
    %150 = math.tanh %149 : vector<8x128xf32>
    %151 = arith.mulf %150, %15 : vector<8x128xf32>
    %152 = arith.addf %151, %18 : vector<8x128xf32>
    %153 = vector.extract_strided_slice %152 {offsets = [0, 0], sizes = [8, 32], strides = [1, 1]} : vector<8x128xf32> to vector<8x32xf32>
    %154 = vector.extract_strided_slice %152 {offsets = [0, 32], sizes = [8, 32], strides = [1, 1]} : vector<8x128xf32> to vector<8x32xf32>
    %155 = vector.extract_strided_slice %152 {offsets = [0, 64], sizes = [8, 32], strides = [1, 1]} : vector<8x128xf32> to vector<8x32xf32>
    %156 = vector.extract_strided_slice %152 {offsets = [0, 96], sizes = [8, 32], strides = [1, 1]} : vector<8x128xf32> to vector<8x32xf32>
    %157 = arith.mulf %154, %139 : vector<8x32xf32>
    %158 = arith.mulf %153, %155 : vector<8x32xf32>
    %159 = arith.addf %157, %158 : vector<8x32xf32>
    %160 = math.tanh %159 : vector<8x32xf32>
    %161 = arith.mulf %156, %160 : vector<8x32xf32>
    %c7_i32 = arith.constant 7 : i32
    %162 = arith.truncf %161 : vector<8x32xf32> to vector<8x32xbf16>
    %c0_35 = arith.constant 0 : index
    %c0_36 = arith.constant 0 : index
    %163 = vector.load %arg5[%c0_35, %c0_36] : memref<32x128xbf16, #tpu.memory_space<vmem>>, vector<32x128xbf16>
    %cst_37 = arith.constant dense<0.000000e+00> : vector<8x128xf32>
    %164 = tpu.matmul %162, %163, %cst_37 {dimension_numbers = #tpu.dot_dimension_numbers<[1], [0], [0], [1], [0, 0, 1, 1], [], []>} : vector<8x32xbf16>, vector<32x128xbf16>, vector<8x128xf32> -> vector<8x128xf32>
    %c0_38 = arith.constant 0 : index
    %c0_39 = arith.constant 0 : index
    %165 = vector.load %arg6[%c0_38, %c0_39] : memref<1x128xf32, #tpu.memory_space<vmem>>, vector<1x128xf32>
    %166 = vector.broadcast %165 : vector<1x128xf32> to vector<8x128xf32>
    %167 = arith.addf %164, %166 : vector<8x128xf32>
    %cst_40 = arith.constant 0.000000e+00 : f32
    %168 = vector.broadcast %cst_40 : f32 to vector<8x128xf32>
    %169 = arith.maximumf %167, %168 : vector<8x128xf32>
    %c0_41 = arith.constant 0 : index
    %c0_42 = arith.constant 0 : index
    %170 = vector.load %arg7[%c0_41, %c0_42] : memref<8x128xf32, #tpu.memory_space<vmem>>, vector<8x128xf32>
    tpu.vector_store %arg7[%c0_41, %c0_42], %169 {strides = array<i32>} : memref<8x128xf32, #tpu.memory_space<vmem>>, vector<8x128xf32>,
    return
  }
  func.func @transform_0(%arg0: i32) -> (i32, i32) {
    %c0_i32 = arith.constant 0 : i32
    %c0_i32_0 = arith.constant 0 : i32
    %c0_i32_1 = arith.constant 0 : i32
    return %c0_i32, %c0_i32_0 : i32, i32
  }
  func.func @transform_1(%arg0: i32) -> (i32, i32) {
    %c0_i32 = arith.constant 0 : i32
    %c0_i32_0 = arith.constant 0 : i32
    %c0_i32_1 = arith.constant 0 : i32
    return %c0_i32, %c0_i32_0 : i32, i32
  }
  func.func @transform_2(%arg0: i32) -> (i32, i32) {
    %c0_i32 = arith.constant 0 : i32
    %c0_i32_0 = arith.constant 0 : i32
    %c0_i32_1 = arith.constant 0 : i32
    return %c0_i32, %c0_i32_0 : i32, i32
  }
  func.func @transform_3(%arg0: i32) -> (i32, i32) {
    %c0_i32 = arith.constant 0 : i32
    %c0_i32_0 = arith.constant 0 : i32
    %c0_i32_1 = arith.constant 0 : i32
    return %c0_i32, %c0_i32_0 : i32, i32
  }
  func.func @transform_4(%arg0: i32) -> (i32, i32) {
    %c0_i32 = arith.constant 0 : i32
    %c0_i32_0 = arith.constant 0 : i32
    %c0_i32_1 = arith.constant 0 : i32
    return %c0_i32, %c0_i32_0 : i32, i32
  }
  func.func @transform_5(%arg0: i32) -> (i32, i32) {
    %c0_i32 = arith.constant 0 : i32
    %c0_i32_0 = arith.constant 0 : i32
    %c0_i32_1 = arith.constant 0 : i32
    return %c0_i32, %c0_i32_0 : i32, i32
  }
  func.func @transform_6(%arg0: i32) -> (i32, i32) {
    %c0_i32 = arith.constant 0 : i32
    %c0_i32_0 = arith.constant 0 : i32
    %c0_i32_1 = arith.constant 0 : i32
    return %c0_i32, %c0_i32_0 : i32, i32
  }
}

</mosaic_0001>

<bundles_post_ra>
// kernel: lstm_forward.1
= control target key start
LH: loop header
LB: loop body
LE: loop exit
PB: predicated region body
PF: predicated region fallthrough
CT: control target
= control target key end

     0   :  { %vm70_vm0 = vcmask 1041408   ;;  %vm57_vm1 = vcmask 31744   ;;  %v904_v1 = vmov 0.0   ;;  %vm905_vm2 = vmmov 0   ;;  %s909_s7 = smov 32   ;;  %s1119_s1 = inlined_call_operand.vmem [shape: bf16[4,128], index: 1, kind: input, shape index: {}]   ;;  %s1120_s2 = inlined_call_operand.vmem [shape: bf16[32,128], index: 2, kind: input, shape index: {}]   ;;  %s1121_s0 = inlined_call_operand.vmem [shape: bf16[56,4], index: 0, kind: input, shape index: {}]   ;;  %s1122_s3 = inlined_call_operand.vmem [shape: f32[1,128], index: 3, kind: input, shape index: {}]   ;;  %s1123_s4 = inlined_call_operand.vmem [shape: bf16[32,128], index: 4, kind: input, shape index: {}]   ;;  %s1124_s5 = inlined_call_operand.vmem [shape: f32[1,128], index: 5, kind: input, shape index: {}]   ;;  %s1125_s6 = inlined_call_operand.vmem [shape: f32[8,128], index: 6, kind: output, shape index: {}]  }
   0x1   :  { %v31_v0 = vld [vmem:[%s1119_s1] sm:$0x3]  ;;  %797 = vmatprep.subr.bf16.mxu1 %v904_v1  ;;  %801 = vmatprep.mubr.msk.bf16.mxu1 %vm905_vm2, %v904_v1  ;;  %v870_v5 = vld [vmem:[%s1121_s0 + $0x8] sm:$0xff]   ;;  %v906_v7 = vmov 0   ;;  %v145_v8 = vlaneseq  ;;  %v907_v16 = vmov 0.5   ;;  %vm169_vm6 = vcmask 261120  }
   0x2   :  { %861 = vmatprep.subr.msk.bf16.mxu0 %vm70_vm0, %v31_v0  ;;  %v72_v2 = vsel %vm70_vm0, %v31_v0, 0  ;;  %v954_v3 = vld [vmem:[%s1120_s2] sm:$0xff]   ;;  %v969_v6 = vld [vmem:[%s1120_s2 + $0x8] sm:$0xff]   ;;  %v872_v53 = vld [vmem:[%s1121_s0 + $0x10] sm:$0xff]  }
   0x3   :  { %788 = vmatpush3.bf16.msra.mxu0 %v72_v2  ;;  %v869_v4 = vld [vmem:[%s1121_s0] sm:$0xff]   ;;  %798 = vmatpush3.bf16.msra.mxu1 %v954_v3  ;;  %v146_v9 = vand.u32 127, %v145_v8  ;;  %v873_v54 = vld [vmem:[%s1121_s0 + $0x18] ss:$0 sps:$4 sm:$0xff]  }
   0x4   :  { %813 = vmatprep.subr.bf16.mxu0 %v904_v1  ;;  %789 = vmatprep.mubr.msk.bf16.mxu0 %vm57_vm1, %v869_v4  ;;  %v987_v10 = vld [vmem:[%s1122_s3] ss:$0 sm:$0xff]  ;;  %s908_s3 = smov 64  }
   0x5   :  { %799 = vmatprep.subr.bf16.mxu1 %v904_v1  ;;  %vm147_vm3 = vcmp.ge.s32.totalorder %v146_v9, 64  ;;  %vm148_vm4 = vcmp.lt.s32.totalorder %v146_v9, 96 }
   0x6   :  { %790 = vmatmul.mubr.msk.bf16.vlgmr.msra.gmra.mrb[0].mxu0 %vm57_vm1, %v870_v5  ;;  %vm149_vm5 = vmand %vm147_vm3, %vm148_vm4 }
   0x7   :  { %814 = vmatpush3.bf16.msra.mxu0 %v954_v3  ;;  %800 = vmatpush3.bf16.msra.mxu1 %v969_v6  ;;  %v994_v17 = vsel %vm149_vm5, 1.0, %v907_v16  ;;  %v997_v25 = vsel %vm149_vm5, 0.0, %v907_v16 }
   0x8   :  { %815 = vmatprep.subr.bf16.mxu0 %v904_v1  ;;  %805 = vmatprep.subr.bf16.mxu1 %v904_v1 }
   0x9   :  { %793 = vmatprep.mubr.msk.bf16.mxu0 %vm57_vm1, %v872_v53 }
   0xa   :  { %802 = vmatmul.mubr.bf16.vlgmr.msra.gmra.mrb[0].mxu1 %v906_v7 }
   0xb   :  { %816 = vmatpush3.bf16.msra.mxu0 %v969_v6  ;;  %806 = vmatpush3.bf16.msra.mxu1 %v954_v3 }
   0xc   :  { %809 = vmatprep.mubr.msk.bf16.mxu1 %vm905_vm2, %v904_v1  ;;  %807 = vmatprep.subr.bf16.mxu1 %v904_v1 }
   0xd   :  { %829 = vmatprep.subr.bf16.mxu0 %v904_v1 }
   0xe   :  { %794 = vmatmul.mubr.msk.bf16.gmra.mrb[4].mxu0 %vm57_vm1, %v873_v54 }
   0xf   :  { %808 = vmatpush3.bf16.msra.mxu1 %v969_v6  ;;  %817 = vmatprep.mubr.msk.bf16.mxu0 %vm905_vm2, %v904_v1 }
  0x10   :  { %821 = vmatprep.subr.bf16.mxu1 %v904_v1 }
  0xd9   :  { %v989_v11 = vpop.f32.mrb[0].mxu0 }
  0xda   :  { %v108_v12 = vpop.f32.mrb[1].mxu0  ;;  %v117_v0 = vadd.f32 %v989_v11, %v987_v10 }
  0xdb   :  { %v109_v13 = vadd.f32 %v987_v10, %v108_v12  ;;  %v992_v14 = vpop.f32.mrb[2].mxu0 }
  0xdc   :  { %v111_v15 = vpop.f32.mrb[3].mxu0 }
  0xdd   :  { %v207_v18 = vpop.f32.mrb[0].mxu1  ;;  %v112_v38 = vadd.f32 %v987_v10, %v111_v15 }
  0xde   :  { %v213_v19 = vadd.f32 %v207_v18, %v109_v13  ;;  %v803_v20 = vpop.f32.mrb[1].mxu1 }
  0xdf   :  { %v210_v21 = vpop.f32.mrb[2].mxu1 }
  0xe0   :  { %v214_v22 = vmul.f32 %v213_v19, %v994_v17  ;;  %v804_v23 = vpop.f32.mrb[3].mxu1 }
  0xe1   :  { %v1030_v59 = vpop.f32.mrb[4].mxu0 }
  0xe2   :  { %876 = vtanh.f32 %v214_v22  ;;  %v1032_v60 = vpop.f32.mrb[5].mxu0 }
  0xe3   :  { %v796_v61 = vpop.f32.mrb[6].mxu0 }
  0xe4   :  { %v1034_v62 = vpop.f32.mrb[7].mxu0 }
  0xec   :  { %v877_v24 = vpop.eup %876 }
  0xed   :  { %v216_v26 = vmul.f32 %v877_v24, %v994_v17 }
  0xef   :  { %v217_v27 = vadd.f32 %v216_v26, %v997_v25 }
  0xf1   :  { %220 = vrot.lane.b32.xlu0 %v217_v27, %s908_s3  ;;  %v218_v30 = vmul.f32 0.0, %v217_v27 }
 0x163   :  { %v221_v28 = vpop.permute.xlu0 %220 }
 0x164   :  { %v223_v29 = vmul.f32 %v221_v28, %v217_v27 }
 0x166   :  { %225 = vrot.lane.b32.xlu0 %v223_v29, %s909_s7 }
 0x1d8   :  { %v226_v31 = vpop.permute.xlu0 %225 }
 0x1d9   :  { %v228_v32 = vadd.f32 %v226_v31, %v218_v30 }
 0x1db   :  { %878 = vtanh.f32 %v228_v32 }
 0x1e5   :  { %v879_v33 = vpop.eup %878 }
 0x1e6   :  { %231 = vrot.lane.b32.xlu1 %v879_v33, %s908_s3 }
 0x258   :  { %v232_v34 = vpop.permute.xlu1 %231 }
 0x259   :  { %v234_v35 = vmul.f32 %v232_v34, %v217_v27  ;;  %v120_v27 = vadd.f32 %v992_v14, %v987_v10 }
 0x25b   :  { %v237_v36 = vpack.c.bf16 %v234_v35, %v234_v35 }
 0x25d   :  { %239 = vrot.lane.b32.xlu1 %v237_v36, %s909_s7 }
 0x2cf   :  { %v240_v37 = vpop.permute.xlu1 %239 }
 0x2d0   :  { %810 = vmatmul.mubr.msk.bf16.vlgmr.msra.gmra.mrb[4].mxu1 %vm169_vm6, %v240_v37 }
 0x2d1   :  { %822 = vmatpush3.bf16.msra.mxu1 %v954_v3  ;;  %825 = vmatprep.mubr.msk.bf16.mxu1 %vm905_vm2, %v904_v1 }
 0x2d2   :  { %823 = vmatprep.subr.bf16.mxu1 %v904_v1 }
 0x2d5   :  { %824 = vmatpush3.bf16.msra.mxu1 %v969_v6 }
 0x2d6   :  { %837 = vmatprep.subr.bf16.mxu1 %v904_v1 }
 0x3a3   :  { %v278_v39 = vpop.f32.mrb[4].mxu1 }
 0x3a4   :  { %v284_v40 = vadd.f32 %v278_v39, %v112_v38  ;;  %v811_v41 = vpop.f32.mrb[5].mxu1 }
 0x3a5   :  { %v281_v42 = vpop.f32.mrb[6].mxu1 }
 0x3a6   :  { %v285_v43 = vmul.f32 %v284_v40, %v994_v17  ;;  %v812_v44 = vpop.f32.mrb[7].mxu1 }
 0x3a8   :  { %880 = vtanh.f32 %v285_v43 }
 0x3b2   :  { %v881_v45 = vpop.eup %880 }
 0x3b3   :  { %v287_v46 = vmul.f32 %v881_v45, %v994_v17 }
 0x3b5   :  { %v288_v47 = vadd.f32 %v287_v46, %v997_v25  ;;  %v125_v46 = vadd.f32 %v987_v10, %v1032_v60 }
 0x3b7   :  { %291 = vrot.lane.b32.xlu0 %v288_v47, %s908_s3  ;;  %v289_v50 = vmul.f32 %v288_v47, %v228_v32 }
 0x429   :  { %v292_v48 = vpop.permute.xlu0 %291 }
 0x42a   :  { %v294_v49 = vmul.f32 %v292_v48, %v288_v47 }
 0x42c   :  { %296 = vrot.lane.b32.xlu1 %v294_v49, %s909_s7 }
 0x49e   :  { %v297_v51 = vpop.permute.xlu1 %296 }
 0x49f   :  { %v299_v52 = vadd.f32 %v297_v51, %v289_v50 }
 0x4a1   :  { %882 = vtanh.f32 %v299_v52 }
 0x4ab   :  { %v883_v55 = vpop.eup %882 }
 0x4ac   :  { %302 = vrot.lane.b32.xlu0 %v883_v55, %s908_s3 }
 0x51e   :  { %v303_v56 = vpop.permute.xlu0 %302 }
 0x51f   :  { %v305_v57 = vmul.f32 %v303_v56, %v288_v47 }
 0x521   :  { %v308_v58 = vpack.c.bf16 %v305_v57, %v305_v57 }
 0x523   :  { %310 = vrot.lane.b32.xlu1 %v308_v58, %s909_s7 }
 0x595   :  { %v311_v63 = vpop.permute.xlu1 %310 }
 0x596   :  { %818 = vmatmul.mubr.msk.bf16.vlgmr.msra.gmra.mrb[8].mxu0 %vm169_vm6, %v311_v63 }
 0x597   :  { %830 = vmatpush3.bf16.msra.mxu0 %v954_v3  ;;  %833 = vmatprep.mubr.msk.bf16.mxu0 %vm905_vm2, %v904_v1 }
 0x598   :  { %831 = vmatprep.subr.bf16.mxu0 %v904_v1 }
 0x59b   :  { %832 = vmatpush3.bf16.msra.mxu0 %v969_v6 }
 0x59c   :  { %845 = vmatprep.subr.bf16.mxu0 %v904_v1 }
 0x669   :  { %v349_v2 = vpop.f32.mrb[8].mxu0 }
 0x66a   :  { %v355_v4 = vadd.f32 %v349_v2, %v117_v0  ;;  %v819_v5 = vpop.f32.mrb[9].mxu0 }
 0x66b   :  { %v352_v7 = vpop.f32.mrb[10].mxu0 }
 0x66c   :  { %v356_v8 = vmul.f32 %v355_v4, %v994_v17  ;;  %v820_v9 = vpop.f32.mrb[11].mxu0  ;;  %v128_v4 = vadd.f32 %v987_v10, %v1034_v62 }
 0x66e   :  { %884 = vtanh.f32 %v356_v8 }
 0x678   :  { %v885_v12 = vpop.eup %884 }
 0x679   :  { %v358_v13 = vmul.f32 %v885_v12, %v994_v17 }
 0x67b   :  { %v359_v15 = vadd.f32 %v358_v13, %v997_v25 }
 0x67d   :  { %362 = vrot.lane.b32.xlu0 %v359_v15, %s908_s3  ;;  %v360_v11 = vmul.f32 %v359_v15, %v299_v52 }
 0x6ef   :  { %v363_v16 = vpop.permute.xlu0 %362 }
 0x6f0   :  { %v365_v18 = vmul.f32 %v363_v16, %v359_v15 }
 0x6f2   :  { %367 = vrot.lane.b32.xlu1 %v365_v18, %s909_s7 }
 0x764   :  { %v368_v19 = vpop.permute.xlu1 %367 }
 0x765   :  { %v370_v20 = vadd.f32 %v368_v19, %v360_v11 }
 0x767   :  { %886 = vtanh.f32 %v370_v20 }
 0x771   :  { %v887_v21 = vpop.eup %886 }
 0x772   :  { %373 = vrot.lane.b32.xlu0 %v887_v21, %s908_s3 }
 0x7e4   :  { %v374_v22 = vpop.permute.xlu0 %373 }
 0x7e5   :  { %v376_v23 = vmul.f32 %v374_v22, %v359_v15 }
 0x7e7   :  { %v379_v24 = vpack.c.bf16 %v376_v23, %v376_v23 }
 0x7e9   :  { %381 = vrot.lane.b32.xlu1 %v379_v24, %s909_s7 }
 0x85b   :  { %v382_v26 = vpop.permute.xlu1 %381 }
 0x85c   :  { %826 = vmatmul.mubr.msk.bf16.vlgmr.msra.gmra.mrb[8].mxu1 %vm169_vm6, %v382_v26 }
 0x85d   :  { %838 = vmatpush3.bf16.msra.mxu1 %v954_v3  ;;  %841 = vmatprep.mubr.msk.bf16.mxu1 %vm905_vm2, %v904_v1 }
 0x85e   :  { %839 = vmatprep.subr.bf16.mxu1 %v904_v1 }
 0x861   :  { %840 = vmatpush3.bf16.msra.mxu1 %v969_v6 }
 0x862   :  { %853 = vmatprep.subr.bf16.mxu1 %v904_v1 }
 0x92f   :  { %v420_v28 = vpop.f32.mrb[8].mxu1 }
 0x930   :  { %v426_v29 = vadd.f32 %v420_v28, %v120_v27  ;;  %v827_v30 = vpop.f32.mrb[9].mxu1  ;;  %v133_v28 = vadd.f32 %v1030_v59, %v987_v10 }
 0x931   :  { %v423_v31 = vpop.f32.mrb[10].mxu1 }
 0x932   :  { %v427_v32 = vmul.f32 %v426_v29, %v994_v17  ;;  %v828_v33 = vpop.f32.mrb[11].mxu1 }
 0x934   :  { %888 = vtanh.f32 %v427_v32 }
 0x93e   :  { %v889_v34 = vpop.eup %888 }
 0x93f   :  { %v429_v35 = vmul.f32 %v889_v34, %v994_v17 }
 0x941   :  { %v430_v36 = vadd.f32 %v429_v35, %v997_v25 }
 0x943   :  { %433 = vrot.lane.b32.xlu0 %v430_v36, %s908_s3  ;;  %v431_v14 = vmul.f32 %v430_v36, %v370_v20 }
 0x9b5   :  { %v434_v37 = vpop.permute.xlu0 %433 }
 0x9b6   :  { %v436_v38 = vmul.f32 %v434_v37, %v430_v36 }
 0x9b8   :  { %438 = vrot.lane.b32.xlu1 %v436_v38, %s909_s7 }
 0xa2a   :  { %v439_v39 = vpop.permute.xlu1 %438 }
 0xa2b   :  { %v441_v40 = vadd.f32 %v439_v39, %v431_v14 }
 0xa2d   :  { %890 = vtanh.f32 %v441_v40 }
 0xa37   :  { %v891_v41 = vpop.eup %890 }
 0xa38   :  { %444 = vrot.lane.b32.xlu0 %v891_v41, %s908_s3 }
 0xaaa   :  { %v445_v42 = vpop.permute.xlu0 %444 }
 0xaab   :  { %v447_v43 = vmul.f32 %v445_v42, %v430_v36 }
 0xaad   :  { %v450_v44 = vpack.c.bf16 %v447_v43, %v447_v43 }
 0xaaf   :  { %452 = vrot.lane.b32.xlu1 %v450_v44, %s909_s7 }
 0xb21   :  { %v453_v45 = vpop.permute.xlu1 %452 }
 0xb22   :  { %834 = vmatmul.mubr.msk.bf16.vlgmr.msra.gmra.mrb[12].mxu0 %vm169_vm6, %v453_v45  ;;  %v754_v45 = vld [vmem:[%s1124_s5] ss:$0 sm:$0xff] }
 0xb23   :  { %846 = vmatpush3.bf16.msra.mxu0 %v954_v3  ;;  %849 = vmatprep.mubr.msk.bf16.mxu0 %vm905_vm2, %v904_v1 }
 0xb24   :  { %847 = vmatprep.subr.bf16.mxu0 %v904_v1 }
 0xb27   :  { %848 = vmatpush3.bf16.msra.mxu0 %v969_v6 }
 0xbf5   :  { %v491_v47 = vpop.f32.mrb[12].mxu0 }
 0xbf6   :  { %v497_v48 = vadd.f32 %v491_v47, %v125_v46  ;;  %v835_v49 = vpop.f32.mrb[13].mxu0 }
 0xbf7   :  { %v494_v50 = vpop.f32.mrb[14].mxu0 }
 0xbf8   :  { %v498_v51 = vmul.f32 %v497_v48, %v994_v17  ;;  %v836_v52 = vpop.f32.mrb[15].mxu0 }
 0xbfa   :  { %892 = vtanh.f32 %v498_v51 }
 0xc04   :  { %v893_v53 = vpop.eup %892 }
 0xc05   :  { %v500_v3 = vmul.f32 %v893_v53, %v994_v17 }
 0xc07   :  { %v501_v54 = vadd.f32 %v500_v3, %v997_v25 }
 0xc09   :  { %504 = vrot.lane.b32.xlu0 %v501_v54, %s908_s3  ;;  %v502_v56 = vmul.f32 %v501_v54, %v441_v40  ;;  %v874_v40 = vld [vmem:[%s1123_s4] sm:$0xff]  }
 0xc7b   :  { %v505_v55 = vpop.permute.xlu0 %504 }
 0xc7c   :  { %v507_v6 = vmul.f32 %v505_v55, %v501_v54 }
 0xc7e   :  { %509 = vrot.lane.b32.xlu1 %v507_v6, %s909_s7 }
 0xcf0   :  { %v510_v57 = vpop.permute.xlu1 %509 }
 0xcf1   :  { %v512_v58 = vadd.f32 %v510_v57, %v502_v56 }
 0xcf3   :  { %894 = vtanh.f32 %v512_v58 }
 0xcfd   :  { %v895_v60 = vpop.eup %894 }
 0xcfe   :  { %515 = vrot.lane.b32.xlu0 %v895_v60, %s908_s3 }
 0xd70   :  { %v516_v61 = vpop.permute.xlu0 %515 }
 0xd71   :  { %v518_v63 = vmul.f32 %v516_v61, %v501_v54 }
 0xd73   :  { %v521_v0 = vpack.c.bf16 %v518_v63, %v518_v63 }
 0xd75   :  { %523 = vrot.lane.b32.xlu1 %v521_v0, %s909_s7 }
 0xde7   :  { %v524_v2 = vpop.permute.xlu1 %523 }
 0xde8   :  { %842 = vmatmul.mubr.msk.bf16.vlgmr.msra.gmra.mrb[12].mxu1 %vm169_vm6, %v524_v2 }
 0xde9   :  { %857 = vmatprep.mubr.msk.bf16.mxu1 %vm905_vm2, %v904_v1  ;;  %854 = vmatpush3.bf16.msra.mxu1 %v874_v40 }
 0xdea   :  { %855 = vmatprep.subr.bf16.mxu1 %v904_v1 }
 0xebb   :  { %v562_v5 = vpop.f32.mrb[12].mxu1 }
 0xebc   :  { %v568_v7 = vadd.f32 %v562_v5, %v128_v4  ;;  %v843_v8 = vpop.f32.mrb[13].mxu1 }
 0xebd   :  { %v565_v9 = vpop.f32.mrb[14].mxu1 }
 0xebe   :  { %v569_v12 = vmul.f32 %v568_v7, %v994_v17  ;;  %v844_v13 = vpop.f32.mrb[15].mxu1 }
 0xec0   :  { %896 = vtanh.f32 %v569_v12 }
 0xeca   :  { %v897_v15 = vpop.eup %896 }
 0xecb   :  { %v571_v16 = vmul.f32 %v897_v15, %v994_v17 }
 0xecd   :  { %v572_v18 = vadd.f32 %v571_v16, %v997_v25 }
 0xecf   :  { %575 = vrot.lane.b32.xlu0 %v572_v18, %s908_s3  ;;  %v573_v62 = vmul.f32 %v572_v18, %v512_v58 }
 0xf41   :  { %v576_v11 = vpop.permute.xlu0 %575 }
 0xf42   :  { %v578_v19 = vmul.f32 %v576_v11, %v572_v18 }
 0xf44   :  { %580 = vrot.lane.b32.xlu1 %v578_v19, %s909_s7 }
 0xfb6   :  { %v581_v20 = vpop.permute.xlu1 %580 }
 0xfb7   :  { %v583_v21 = vadd.f32 %v581_v20, %v573_v62 }
 0xfb9   :  { %898 = vtanh.f32 %v583_v21 }
 0xfc3   :  { %v899_v22 = vpop.eup %898 }
 0xfc4   :  { %586 = vrot.lane.b32.xlu0 %v899_v22, %s908_s3 }
0x1036   :  { %v587_v23 = vpop.permute.xlu0 %586 }
0x1037   :  { %v589_v24 = vmul.f32 %v587_v23, %v572_v18 }
0x1039   :  { %v592_v26 = vpack.c.bf16 %v589_v24, %v589_v24 }
0x103b   :  { %594 = vrot.lane.b32.xlu1 %v592_v26, %s909_s7 }
0x10ad   :  { %v595_v27 = vpop.permute.xlu1 %594 }
0x10ae   :  { %850 = vmatmul.mubr.msk.bf16.vlgmr.msra.gmra.mrb[16].mxu0 %vm169_vm6, %v595_v27 }
0x1181   :  { %v633_v29 = vpop.f32.mrb[16].mxu0 }
0x1182   :  { %v639_v30 = vadd.f32 %v633_v29, %v133_v28  ;;  %v851_v31 = vpop.f32.mrb[17].mxu0 }
0x1183   :  { %v636_v32 = vpop.f32.mrb[18].mxu0 }
0x1184   :  { %v640_v33 = vmul.f32 %v639_v30, %v994_v17  ;;  %v852_v34 = vpop.f32.mrb[19].mxu0 }
0x1186   :  { %900 = vtanh.f32 %v640_v33 }
0x1190   :  { %v901_v35 = vpop.eup %900 }
0x1191   :  { %v642_v36 = vmul.f32 %v901_v35, %v994_v17  ;;  %v875_v17 = vld [vmem:[%s1123_s4 + $0x8] sm:$0xff]  }
0x1192   :  { %856 = vmatpush3.bf16.msra.mxu1 %v875_v17 }
0x1193   :  { %v643_v37 = vadd.f32 %v642_v36, %v997_v25 }
0x1195   :  { %646 = vrot.lane.b32.xlu0 %v643_v37, %s908_s3  ;;  %v644_v10 = vmul.f32 %v643_v37, %v583_v21 }
0x1207   :  { %v647_v38 = vpop.permute.xlu0 %646 }
0x1208   :  { %v649_v14 = vmul.f32 %v647_v38, %v643_v37 }
0x120a   :  { %651 = vrot.lane.b32.xlu1 %v649_v14, %s909_s7 }
0x127c   :  { %v652_v59 = vpop.permute.xlu1 %651 }
0x127d   :  { %v654_v39 = vadd.f32 %v652_v59, %v644_v10 }
0x127f   :  { %902 = vtanh.f32 %v654_v39 }
0x1289   :  { %v903_v25 = vpop.eup %902 }
0x128a   :  { %657 = vrot.lane.b32.xlu0 %v903_v25, %s908_s3 }
0x12fc   :  { %v658_v41 = vpop.permute.xlu0 %657 }
0x12fd   :  { %v660_v42 = vmul.f32 %v658_v41, %v643_v37 }
0x12ff   :  { %v661_v43 = vpack.c.bf16 %v660_v42, %v660_v42 }
0x1301   :  { %674 = vrot.lane.b32.xlu1 %v661_v43, %s909_s7 }
0x1373   :  { %v675_v44 = vpop.permute.xlu1 %674 }
0x1374   :  { %858 = vmatmul.mubr.msk.bf16.vlgmr.msra.gmra.mrb[16].mxu1 %vm169_vm6, %v675_v44 }
0x1447   :  { %v725_v46 = vpop.f32.mrb[16].mxu1 }
0x1448   :  { %v726_v47 = vadd.f32 %v754_v45, %v725_v46  ;;  %v859_v48 = vpop.f32.mrb[17].mxu1 }
0x1449   :  { %v728_v1 = vpop.f32.mrb[18].mxu1 }
0x144a   :  { %v731_v49 = vmax.f32 %v726_v47, 0.0  ;;  %v860_v50 = vpop.f32.mrb[19].mxu1 }
0x144c   :  { %732 = vst [vmem:[%s1125_s6] sm:$0xff] %v731_v49 }

</bundles_post_ra>
